<compile_context>
chip_gen: v7x
topology: tpu7x:2x2x1
jax: 0.10.0
libtpu: 0.0.40
codegen_flags: <defaults>
</compile_context>

<pallas_src>
import functools

import jax
import jax.numpy as jnp
from jax import lax
from jax.experimental import pallas as pl
from jax.experimental.pallas import tpu as pltpu


PAD_ID = 0
CLIP_LOSS_WEIGHT = 1.0
CAPTION_LOSS_WEIGHT = 2.0


# --------------------------- generation-aware sizing ---------------------------

def _tpu_generation():
    try:
        kind = jax.devices()[0].device_kind.lower()
    except Exception:
        return 6
    for g in (7, 6, 5, 4):
        if f"v{g}" in kind:
            return g
    return 6


def _vmem_config():
    gen = _tpu_generation()
    if gen >= 7:
        # v7x: 64 MiB physical / 32 MiB scoped VMEM -> smaller tiles, deeper pipeline,
        # and split the caption grid across the 2 TensorCores.
        return dict(tile_bytes=6 * 1024 * 1024, vmem_limit=32 * 1024 * 1024,
                    logits_buffers=3, splits=2)
    # v5e / v6e: 128 MiB physical VMEM -> bigger tiles, default double-buffering.
    # (v5e's default scoped VMEM is only 16 MiB, so the explicit limit is mandatory.)
    return dict(tile_bytes=12 * 1024 * 1024, vmem_limit=64 * 1024 * 1024,
                logits_buffers=2, splits=1)


# ----------------------------- CLIP contrastive loss -----------------------------

def _clip_loss_kernel(img_ref, txt_ref, scale_ref, out_ref):
    scale = scale_ref[0]
    img = img_ref[...]          # native dtype (bf16 stays bf16 -> single-pass MXU)
    txt = txt_ref[...]

    # diag(S) = scale * sum(img * txt, -1): one lane-wise [B, D] reduce in f32 (cheap
    # O(B*D) VPU work), shared by both loss directions.
    diag = scale * jnp.sum(img.astype(jnp.float32) * txt.astype(jnp.float32),
                           axis=-1, keepdims=True)                       # [B, 1]

    def _row_lse(a, b):
        # rows of scale*(a @ b.T): last-dim contraction, f32 accumulation on the MXU,
        # logit_scale applied to the f32 scores.  Max and sum stay lane-wise (axis=-1),
        # never the expensive sublane axis=0 path.
        s = lax.dot_general(a, b, (((1,), (1,)), ((), ())),
                            preferred_element_type=jnp.float32)          # [B, B]
        s = s * scale
        m = jnp.max(s, axis=-1, keepdims=True)
        return m + jnp.log(jnp.sum(jnp.exp(s - m), axis=-1, keepdims=True))

    lse_i2t = _row_lse(img, txt)   # rows of S      (image -> text CE)
    lse_t2i = _row_lse(txt, img)   # rows of S^T    (text -> image CE); MXU otherwise idle

    loss = 0.5 * (jnp.mean(lse_i2t - diag) + jnp.mean(lse_t2i - diag))
    out_ref[0] = loss


def clip_loss(image_features, text_features, logit_scale):
    # TODO(synk): flash-style (B/tm, B/tn) tiling for very large all-gathered batches so
    # the [B, B] score matrix never materializes (VMEM ceiling ~1.5-2k rows on v7x).
    cfg = _vmem_config()
    scale_arr = jnp.asarray(logit_scale, dtype=jnp.float32).reshape((1,))
    out = pl.pallas_call(
        _clip_loss_kernel,
        out_shape=jax.ShapeDtypeStruct((1,), jnp.float32),
        in_specs=[
            pl.BlockSpec(memory_space=pltpu.MemorySpace.VMEM),
            pl.BlockSpec(memory_space=pltpu.MemorySpace.VMEM),
            pl.BlockSpec(memory_space=pltpu.MemorySpace.SMEM),
        ],
        out_specs=pl.BlockSpec(memory_space=pltpu.MemorySpace.SMEM),
        compiler_params=pltpu.CompilerParams(vmem_limit_bytes=cfg["vmem_limit"]),
    )(image_features, text_features, scale_arr)
    return out[0]


# ------------------------------- Caption (LM) loss --------------------------------

def _caption_loss_kernel(n_rows, blocks_per_split,
                         logits_ref, labels_ref, out_ref, loss_acc, cnt_acc):
    c = pl.program_id(0)           # TensorCore split (parallel axis)
    i = pl.program_id(1)           # token-tile index within the split (arbitrary axis)

    @pl.when(i == 0)
    def _init():
        loss_acc[...] = jnp.zeros_like(loss_acc)
        cnt_acc[...] = jnp.zeros_like(cnt_acc)

    logits = logits_ref[...].astype(jnp.float32)   # upcast in-register; HBM stays bf16
    labels = labels_ref[...]                       # [TN, 1] int32
    tn, v = logits.shape

    # One shifted operand shared by the exp and the target-logit gather:
    #   per_tok = lse - logit[label] = log(sum(exp(logits - m))) - (logits[label] - m)
    m = jnp.max(logits, axis=-1, keepdims=True)                                  # [TN, 1]
    shifted = logits - m
    sumexp = jnp.sum(jnp.exp(shifted), axis=-1, keepdims=True)                   # [TN, 1]
    vocab_ids = lax.broadcasted_iota(jnp.int32, (tn, v), 1)
    gathered = jnp.sum(jnp.where(vocab_ids == labels, shifted, 0.0),
                       axis=-1, keepdims=True)                                   # [TN, 1]
    per_tok = jnp.log(sumexp) - gathered

    # Mask PAD tokens and the garbage rows of the ragged / out-of-range last tile
    # (mask BEFORE summing, via select, so garbage NaN/Inf cannot propagate).
    row_ids = ((c * blocks_per_split + i) * tn
               + lax.broadcasted_iota(jnp.int32, (tn, 1), 0))
    valid = (labels != PAD_ID) & (row_ids < n_rows)

    # VMEM vector accumulators (elementwise adds only); the cross-sublane collapse
    # happens once per split in the finalize step.
    loss_acc[...] += jnp.where(valid, per_tok, 0.0)
    cnt_acc[...] += valid.astype(jnp.float32)

    @pl.when(i == pl.num_programs(1) - 1)
    def _finalize():
        loss_s = jnp.sum(loss_acc[...])
        cnt_s = jnp.sum(cnt_acc[...])
        rows = lax.broadcasted_iota(jnp.int32, (8, 128), 0)
        out_ref[...] = jnp.where(rows == 0, loss_s, jnp.where(rows == 1, cnt_s, 0.0))


def _pick_tile_n(n, v, itemsize, byte_budget):
    # Size the token tile by bytes (per-generation budget), not rows; multiple of 16 so
    # bf16 sublane packing stays aligned.
    t = byte_budget // max(itemsize * v, 1)
    t = max(16, (t // 16) * 16)
    n16 = ((n + 15) // 16) * 16
    return min(t, n16)


def caption_loss_sums(logits, labels, *, force_tile_n=None, force_splits=None):
    b, t, v = logits.shape
    n = b * t
    # No jnp.pad: the [N, V] logits are streamed exactly once, in their native dtype
    # (bf16 stays bf16 -> half the HBM bytes); the ragged tail is masked in the kernel.
    logits2d = logits.reshape(n, v)
    labels2d = labels.reshape(n, 1).astype(jnp.int32)

    cfg = _vmem_config()
    tile_n = force_tile_n if force_tile_n is not None else _pick_tile_n(
        n, v, logits.dtype.itemsize, cfg["tile_bytes"])
    num_blocks = pl.cdiv(n, tile_n)
    num_splits = force_splits if force_splits is not None else cfg["splits"]
    num_splits = max(1, min(num_splits, num_blocks))
    bps = pl.cdiv(num_blocks, num_splits)

    # Logical block c*bps+i can run past the last real block when bps*num_splits exceeds
    # num_blocks; clamp the DMA index (those rows are fully masked by the row-id check).
    def data_idx(c, i):
        return (jnp.minimum(c * bps + i, num_blocks - 1), 0)

    if cfg["logits_buffers"] != 2:
        logits_spec = pl.BlockSpec((tile_n, v), data_idx,
                                   pipeline_mode=pl.Buffered(cfg["logits_buffers"]))
    else:
        logits_spec = pl.BlockSpec((tile_n, v), data_idx)

    kernel = functools.partial(_caption_loss_kernel, n, bps)

    out = pl.pallas_call(
        kernel,
        out_shape=jax.ShapeDtypeStruct((num_splits * 8, 128), jnp.float32),
        grid_spec=pltpu.PrefetchScalarGridSpec(
            num_scalar_prefetch=0,
            grid=(num_splits, bps),
            in_specs=[
                logits_spec,
                pl.BlockSpec((tile_n, 1), data_idx),
            ],
            # One (8,128) partial-result tile per split, written at the split's last
            # step; distinct output blocks make the leading axis safe to run
            # core-parallel on v7x (and a no-op on single-TC v5e/v6e).
            out_specs=pl.BlockSpec((8, 128), lambda c, i: (c, 0)),
            scratch_shapes=[pltpu.VMEM((tile_n, 1), jnp.float32),
                            pltpu.VMEM((tile_n, 1), jnp.float32)],
        ),
        compiler_params=pltpu.CompilerParams(
            dimension_semantics=("parallel", "arbitrary"),
            vmem_limit_bytes=cfg["vmem_limit"],
        ),
    )(logits2d, labels2d)

    parts = out.reshape(num_splits, 8, 128)
    return jnp.sum(parts[:, 0, 0]), jnp.sum(parts[:, 1, 0])


def caption_loss(logits, labels, *, force_tile_n=None, force_splits=None):
    loss_sum, count = caption_loss_sums(logits, labels,
                                        force_tile_n=force_tile_n,
                                        force_splits=force_splits)
    # Guard against an all-PAD batch (would otherwise divide by zero).
    return loss_sum / jnp.maximum(count, 1.0)


# ---------------------------------- CoCaLoss wrapper -------------------------------

@jax.jit
def coca_loss(image_features, text_features, logits, labels, logit_scale):
    # world_size == 1, no distributed gather (single device).
    cl = CLIP_LOSS_WEIGHT * clip_loss(image_features, text_features, logit_scale)
    cap = CAPTION_LOSS_WEIGHT * caption_loss(logits, labels)
    return cl, cap


# ------------------------------------- reference -----------------------------------

def _caption_reference(logits, labels):
    n, v = labels.size, logits.shape[-1]
    lg = logits.astype(jnp.float32).reshape(n, v)
    lb = labels.reshape(n)
    lse = jax.nn.logsumexp(lg, axis=1)
    per_tok = lse - lg[jnp.arange(n), lb]
    valid = lb != PAD_ID
    return jnp.sum(jnp.where(valid, per_tok, 0.0)) / jnp.maximum(jnp.sum(valid), 1)


def _reference(image_features, text_features, logits, labels, logit_scale):
    imf = image_features.astype(jnp.float32)
    txf = text_features.astype(jnp.float32)
    s = logit_scale * imf @ txf.T
    b = s.shape[0]
    lbl = jnp.arange(b)

    def ce(x, y):
        lse = jax.nn.logsumexp(x, axis=1)
        return jnp.mean(lse - x[jnp.arange(x.shape[0]), y])

    cl = CLIP_LOSS_WEIGHT * 0.5 * (ce(s, lbl) + ce(s.T, lbl))
    cap = CAPTION_LOSS_WEIGHT * _caption_reference(logits, labels)
    return cl, cap


if __name__ == "__main__":
    key = jax.random.PRNGKey(0)
    k1, k2, k3, k4, k5, k6 = jax.random.split(key, 6)

    B, D, T, V = 8, 32, 8, 128

    image_features = jax.random.normal(k1, (B, D), dtype=jnp.float32)
    text_features = jax.random.normal(k2, (B, D), dtype=jnp.float32)
    logits = jax.random.normal(k3, (B, T, V), dtype=jnp.float32)
    labels = jax.random.randint(k4, (B, T), 0, V, dtype=jnp.int32)
    # force some pad tokens to exercise ignore_index
    labels = labels.at[:, 0].set(PAD_ID)
    logit_scale = jnp.float32(2.5)

    cl, cap = coca_loss(image_features, text_features, logits, labels, logit_scale)
    jax.block_until_ready((cl, cap))

    # self-check against pure-JAX reference
    cl_ref, cap_ref = _reference(image_features, text_features, logits, labels, logit_scale)
    assert jnp.allclose(cl, cl_ref, atol=1e-4, rtol=1e-4), (cl, cl_ref)
    assert jnp.allclose(cap, cap_ref, atol=1e-4, rtol=1e-4), (cap, cap_ref)

    # Stress the ragged-last-tile + multi-block + split-grid path: bf16 streamed logits,
    # N = 104 tokens not a multiple of the 16-row tile, two splits of 4 tiles with one
    # clamped out-of-range block.
    B2, T2, V2 = 4, 26, 128
    logits2 = jax.random.normal(k5, (B2, T2, V2), dtype=jnp.bfloat16)
    labels2 = jax.random.randint(k6, (B2, T2), 0, V2, dtype=jnp.int32)
    labels2 = labels2.at[:, :3].set(PAD_ID)
    cap2 = caption_loss(logits2, labels2, force_tile_n=16, force_splits=2)
    jax.block_until_ready(cap2)
    cap2_ref = _caption_reference(logits2, labels2)
    assert jnp.allclose(cap2, cap2_ref, atol=2e-3, rtol=2e-3), (cap2, cap2_ref)

    print("KERNEL_OK")
</pallas_src>

<mosaic_0001>
module attributes {stable_mosaic.version = 11 : i64} {
  func.func @_clip_loss_kernel(%arg0: memref<8x32xf32, #tpu.memory_space<vmem>>, %arg1: memref<8x32xf32, #tpu.memory_space<vmem>>, %arg2: memref<1xf32, #tpu.memory_space<smem>>, %arg3: memref<1xf32, #tpu.memory_space<smem>>) attributes {dimension_semantics = [], scalar_prefetch = 0 : i64, scratch_operands = 0 : i64, tpu.core_type = #tpu.core_type<tc>} {
    %c0 = arith.constant 0 : index
    %0 = memref.load %arg2[%c0] : memref<1xf32, #tpu.memory_space<smem>>
    %c0_0 = arith.constant 0 : index
    %c0_1 = arith.constant 0 : index
    %1 = vector.load %arg0[%c0_0, %c0_1] : memref<8x32xf32, #tpu.memory_space<vmem>>, vector<8x32xf32>
    %c0_2 = arith.constant 0 : index
    %c0_3 = arith.constant 0 : index
    %2 = vector.load %arg1[%c0_2, %c0_3] : memref<8x32xf32, #tpu.memory_space<vmem>>, vector<8x32xf32>
    %3 = arith.mulf %1, %2 : vector<8x32xf32>
    %cst = arith.constant dense<0.000000e+00> : vector<8xf32>
    %4 = vector.multi_reduction <add>, %3, %cst [1] : vector<8x32xf32> to vector<8xf32>
    %5 = vector.shape_cast %4 : vector<8xf32> to vector<8x1xf32>
    %6 = vector.broadcast %0 : f32 to vector<8x1xf32>
    %7 = arith.mulf %6, %5 : vector<8x1xf32>
    %cst_4 = arith.constant dense<0.000000e+00> : vector<8x8xf32>
    %8 = tpu.matmul %1, %2, %cst_4 {dimension_numbers = #tpu.dot_dimension_numbers<[1], [1], [0], [0], [0, 0, 1, 0], [], []>} : vector<8x32xf32>, vector<8x32xf32>, vector<8x8xf32> -> vector<8x8xf32>
    %9 = vector.broadcast %0 : f32 to vector<8x8xf32>
    %10 = arith.mulf %8, %9 : vector<8x8xf32>
    %cst_5 = arith.constant dense<0xFF800000> : vector<8xf32>
    %11 = vector.multi_reduction <maximumf>, %10, %cst_5 [1] : vector<8x8xf32> to vector<8xf32>
    %12 = vector.shape_cast %11 : vector<8xf32> to vector<8x1xf32>
    %13 = vector.broadcast %12 : vector<8x1xf32> to vector<8x8xf32>
    %14 = arith.subf %10, %13 : vector<8x8xf32>
    %15 = math.exp %14 : vector<8x8xf32>
    %cst_6 = arith.constant dense<0.000000e+00> : vector<8xf32>
    %16 = vector.multi_reduction <add>, %15, %cst_6 [1] : vector<8x8xf32> to vector<8xf32>
    %17 = vector.shape_cast %16 : vector<8xf32> to vector<8x1xf32>
    %18 = math.log %17 : vector<8x1xf32>
    %19 = arith.addf %12, %18 : vector<8x1xf32>
    %cst_7 = arith.constant dense<0.000000e+00> : vector<8x8xf32>
    %20 = tpu.matmul %2, %1, %cst_7 {dimension_numbers = #tpu.dot_dimension_numbers<[1], [1], [0], [0], [0, 0, 1, 0], [], []>} : vector<8x32xf32>, vector<8x32xf32>, vector<8x8xf32> -> vector<8x8xf32>
    %21 = vector.broadcast %0 : f32 to vector<8x8xf32>
    %22 = arith.mulf %20, %21 : vector<8x8xf32>
    %cst_8 = arith.constant dense<0xFF800000> : vector<8xf32>
    %23 = vector.multi_reduction <maximumf>, %22, %cst_8 [1] : vector<8x8xf32> to vector<8xf32>
    %24 = vector.shape_cast %23 : vector<8xf32> to vector<8x1xf32>
    %25 = vector.broadcast %24 : vector<8x1xf32> to vector<8x8xf32>
    %26 = arith.subf %22, %25 : vector<8x8xf32>
    %27 = math.exp %26 : vector<8x8xf32>
    %cst_9 = arith.constant dense<0.000000e+00> : vector<8xf32>
    %28 = vector.multi_reduction <add>, %27, %cst_9 [1] : vector<8x8xf32> to vector<8xf32>
    %29 = vector.shape_cast %28 : vector<8xf32> to vector<8x1xf32>
    %30 = math.log %29 : vector<8x1xf32>
    %31 = arith.addf %24, %30 : vector<8x1xf32>
    %32 = arith.subf %19, %7 : vector<8x1xf32>
    %33 = vector.shape_cast %32 : vector<8x1xf32> to vector<1x8x1xf32>
    %cst_10 = arith.constant dense<0.000000e+00> : vector<1xf32>
    %34 = vector.multi_reduction <add>, %33, %cst_10 [1, 2] : vector<1x8x1xf32> to vector<1xf32>
    %35 = vector.shape_cast %34 : vector<1xf32> to vector<1x1x1xf32>
    %36 = vector.extract %35[0, 0, 0] : f32 from vector<1x1x1xf32>
    %cst_11 = arith.constant 8.000000e+00 : f32
    %37 = arith.divf %36, %cst_11 : f32
    %38 = arith.subf %31, %7 : vector<8x1xf32>
    %39 = vector.shape_cast %38 : vector<8x1xf32> to vector<1x8x1xf32>
    %cst_12 = arith.constant dense<0.000000e+00> : vector<1xf32>
    %40 = vector.multi_reduction <add>, %39, %cst_12 [1, 2] : vector<1x8x1xf32> to vector<1xf32>
    %41 = vector.shape_cast %40 : vector<1xf32> to vector<1x1x1xf32>
    %42 = vector.extract %41[0, 0, 0] : f32 from vector<1x1x1xf32>
    %cst_13 = arith.constant 8.000000e+00 : f32
    %43 = arith.divf %42, %cst_13 : f32
    %44 = arith.addf %37, %43 : f32
    %cst_14 = arith.constant 5.000000e-01 : f32
    %45 = arith.mulf %cst_14, %44 : f32
    %c0_15 = arith.constant 0 : index
    %46 = memref.load %arg3[%c0_15] : memref<1xf32, #tpu.memory_space<smem>>
    memref.store %45, %arg3[%c0_15] : memref<1xf32, #tpu.memory_space<smem>>
    return
  }
}

module attributes {stable_mosaic.version = 11 : i64} {
  func.func @_caption_loss_kernel(%arg0: i32, %arg1: i32, %arg2: memref<64x128xf32, #tpu.memory_space<vmem>>, %arg3: memref<64x1xi32, #tpu.memory_space<vmem>>, %arg4: memref<8x128xf32, #tpu.memory_space<vmem>>, %arg5: memref<64x1xf32, #tpu.memory_space<vmem>>, %arg6: memref<64x1xf32, #tpu.memory_space<vmem>>) attributes {dimension_semantics = [#tpu.dimension_semantics<parallel>, #tpu.dimension_semantics<arbitrary>], iteration_bounds = array<i64: 1, 1>, scalar_prefetch = 0 : i64, scratch_operands = 2 : i64, tpu.core_type = #tpu.core_type<tc>, window_params = [{transform_indices = @transform_0, window_bounds = array<i64: 64, 128>}, {transform_indices = @transform_1, window_bounds = array<i64: 64, 1>}, {transform_indices = @transform_2, window_bounds = array<i64: 8, 128>}]} {
    %c0_i32 = arith.constant 0 : i32
    %0 = arith.cmpi eq, %arg1, %c0_i32 : i32
    %1 = arith.extui %0 : i1 to i32
    %c0_i32_0 = arith.constant 0 : i32
    %2 = arith.cmpi ne, %1, %c0_i32_0 : i32
    scf.if %2 {
      %cst_20 = arith.constant 0.000000e+00 : f32
      %45 = vector.broadcast %cst_20 : f32 to vector<64x1xf32>
      %c0_21 = arith.constant 0 : index
      %c0_22 = arith.constant 0 : index
      %46 = vector.load %arg5[%c0_21, %c0_22] : memref<64x1xf32, #tpu.memory_space<vmem>>, vector<64x1xf32>
      tpu.vector_store %arg5[%c0_21, %c0_22], %45 {strides = array<i32>} : memref<64x1xf32, #tpu.memory_space<vmem>>, vector<64x1xf32>,
      %cst_23 = arith.constant 0.000000e+00 : f32
      %47 = vector.broadcast %cst_23 : f32 to vector<64x1xf32>
      %c0_24 = arith.constant 0 : index
      %c0_25 = arith.constant 0 : index
      %48 = vector.load %arg6[%c0_24, %c0_25] : memref<64x1xf32, #tpu.memory_space<vmem>>, vector<64x1xf32>
      tpu.vector_store %arg6[%c0_24, %c0_25], %47 {strides = array<i32>} : memref<64x1xf32, #tpu.memory_space<vmem>>, vector<64x1xf32>,
    } else {
    }
    %c0 = arith.constant 0 : index
    %c0_1 = arith.constant 0 : index
    %3 = vector.load %arg2[%c0, %c0_1] : memref<64x128xf32, #tpu.memory_space<vmem>>, vector<64x128xf32>
    %c0_2 = arith.constant 0 : index
    %c0_3 = arith.constant 0 : index
    %4 = vector.load %arg3[%c0_2, %c0_3] : memref<64x1xi32, #tpu.memory_space<vmem>>, vector<64x1xi32>
    %cst = arith.constant dense<0xFF800000> : vector<64xf32>
    %5 = vector.multi_reduction <maximumf>, %3, %cst [1] : vector<64x128xf32> to vector<64xf32>
    %6 = vector.shape_cast %5 : vector<64xf32> to vector<64x1xf32>
    %7 = vector.broadcast %6 : vector<64x1xf32> to vector<64x128xf32>
    %8 = arith.subf %3, %7 : vector<64x128xf32>
    %9 = math.exp %8 : vector<64x128xf32>
    %cst_4 = arith.constant dense<0.000000e+00> : vector<64xf32>
    %10 = vector.multi_reduction <add>, %9, %cst_4 [1] : vector<64x128xf32> to vector<64xf32>
    %11 = vector.shape_cast %10 : vector<64xf32> to vector<64x1xf32>
    %12 = tpu.iota {dimensions = array<i32: 1>} : vector<64x128xi32>
    %13 = vector.broadcast %4 : vector<64x1xi32> to vector<64x128xi32>
    %14 = arith.cmpi eq, %12, %13 : vector<64x128xi32>
    %cst_5 = arith.constant 0.000000e+00 : f32
    %15 = vector.broadcast %cst_5 : f32 to vector<64x128xf32>
    %16 = arith.select %14, %8, %15 : vector<64x128xi1>, vector<64x128xf32>
    %cst_6 = arith.constant dense<0.000000e+00> : vector<64xf32>
    %17 = vector.multi_reduction <add>, %16, %cst_6 [1] : vector<64x128xf32> to vector<64xf32>
    %18 = vector.shape_cast %17 : vector<64xf32> to vector<64x1xf32>
    %19 = math.log %11 : vector<64x1xf32>
    %20 = arith.subf %19, %18 : vector<64x1xf32>
    %c1_i32 = arith.constant 1 : i32
    %21 = arith.muli %arg0, %c1_i32 : i32
    %22 = arith.addi %21, %arg1 : i32
    %c64_i32 = arith.constant 64 : i32
    %23 = arith.muli %22, %c64_i32 : i32
    %24 = tpu.iota {dimensions = array<i32: 0>} : vector<64x1xi32>
    %25 = vector.broadcast %23 : i32 to vector<64x1xi32>
    %26 = arith.addi %25, %24 : vector<64x1xi32>
    %c0_i32_7 = arith.constant 0 : i32
    %27 = vector.broadcast %c0_i32_7 : i32 to vector<64x1xi32>
    %28 = arith.cmpi ne, %4, %27 : vector<64x1xi32>
    %c64_i32_8 = arith.constant 64 : i32
    %29 = vector.broadcast %c64_i32_8 : i32 to vector<64x1xi32>
    %30 = arith.cmpi slt, %26, %29 : vector<64x1xi32>
    %31 = arith.andi %28, %30 : vector<64x1xi1>
    %c0_9 = arith.constant 0 : index
    %c0_10 = arith.constant 0 : index
    %32 = vector.load %arg5[%c0_9, %c0_10] : memref<64x1xf32, #tpu.memory_space<vmem>>, vector<64x1xf32>
    %cst_11 = arith.constant 0.000000e+00 : f32
    %33 = vector.broadcast %cst_11 : f32 to vector<64x1xf32>
    %34 = arith.select %31, %20, %33 : vector<64x1xi1>, vector<64x1xf32>
    %35 = arith.addf %32, %34 : vector<64x1xf32>
    %c0_12 = arith.constant 0 : index
    %c0_13 = arith.constant 0 : index
    %36 = vector.load %arg5[%c0_12, %c0_13] : memref<64x1xf32, #tpu.memory_space<vmem>>, vector<64x1xf32>
    tpu.vector_store %arg5[%c0_12, %c0_13], %35 {strides = array<i32>} : memref<64x1xf32, #tpu.memory_space<vmem>>, vector<64x1xf32>,
    %c0_14 = arith.constant 0 : index
    %c0_15 = arith.constant 0 : index
    %37 = vector.load %arg6[%c0_14, %c0_15] : memref<64x1xf32, #tpu.memory_space<vmem>>, vector<64x1xf32>
    %38 = arith.extui %31 : vector<64x1xi1> to vector<64x1xi32>
    %39 = arith.sitofp %38 : vector<64x1xi32> to vector<64x1xf32>
    %40 = arith.addf %37, %39 : vector<64x1xf32>
    %c0_16 = arith.constant 0 : index
    %c0_17 = arith.constant 0 : index
    %41 = vector.load %arg6[%c0_16, %c0_17] : memref<64x1xf32, #tpu.memory_space<vmem>>, vector<64x1xf32>
    tpu.vector_store %arg6[%c0_16, %c0_17], %40 {strides = array<i32>} : memref<64x1xf32, #tpu.memory_space<vmem>>, vector<64x1xf32>,
    %c0_i32_18 = arith.constant 0 : i32
    %42 = arith.cmpi eq, %arg1, %c0_i32_18 : i32
    %43 = arith.extui %42 : i1 to i32
    %c0_i32_19 = arith.constant 0 : i32
    %44 = arith.cmpi ne, %43, %c0_i32_19 : i32
    scf.if %44 {
      %c0_20 = arith.constant 0 : index
      %c0_21 = arith.constant 0 : index
      %45 = vector.load %arg5[%c0_20, %c0_21] : memref<64x1xf32, #tpu.memory_space<vmem>>, vector<64x1xf32>
      %46 = vector.shape_cast %45 : vector<64x1xf32> to vector<1x64x1xf32>
      %cst_22 = arith.constant dense<0.000000e+00> : vector<1xf32>
      %47 = vector.multi_reduction <add>, %46, %cst_22 [1, 2] : vector<1x64x1xf32> to vector<1xf32>
      %48 = vector.shape_cast %47 : vector<1xf32> to vector<1x1x1xf32>
      %49 = vector.extract %48[0, 0, 0] : f32 from vector<1x1x1xf32>
      %c0_23 = arith.constant 0 : index
      %c0_24 = arith.constant 0 : index
      %50 = vector.load %arg6[%c0_23, %c0_24] : memref<64x1xf32, #tpu.memory_space<vmem>>, vector<64x1xf32>
      %51 = vector.shape_cast %50 : vector<64x1xf32> to vector<1x64x1xf32>
      %cst_25 = arith.constant dense<0.000000e+00> : vector<1xf32>
      %52 = vector.multi_reduction <add>, %51, %cst_25 [1, 2] : vector<1x64x1xf32> to vector<1xf32>
      %53 = vector.shape_cast %52 : vector<1xf32> to vector<1x1x1xf32>
      %54 = vector.extract %53[0, 0, 0] : f32 from vector<1x1x1xf32>
      %55 = tpu.iota {dimensions = array<i32: 0>} : vector<8x128xi32>
      %c0_i32_26 = arith.constant 0 : i32
      %56 = vector.broadcast %c0_i32_26 : i32 to vector<8x128xi32>
      %57 = arith.cmpi eq, %55, %56 : vector<8x128xi32>
      %c1_i32_27 = arith.constant 1 : i32
      %58 = vector.broadcast %c1_i32_27 : i32 to vector<8x128xi32>
      %59 = arith.cmpi eq, %55, %58 : vector<8x128xi32>
      %cst_28 = arith.constant 0.000000e+00 : f32
      %60 = vector.broadcast %54 : f32 to vector<8x128xf32>
      %61 = vector.broadcast %cst_28 : f32 to vector<8x128xf32>
      %62 = arith.select %59, %60, %61 : vector<8x128xi1>, vector<8x128xf32>
      %63 = vector.broadcast %49 : f32 to vector<8x128xf32>
      %64 = arith.select %57, %63, %62 : vector<8x128xi1>, vector<8x128xf32>
      %c0_29 = arith.constant 0 : index
      %c0_30 = arith.constant 0 : index
      %65 = vector.load %arg4[%c0_29, %c0_30] : memref<8x128xf32, #tpu.memory_space<vmem>>, vector<8x128xf32>
      tpu.vector_store %arg4[%c0_29, %c0_30], %64 {strides = array<i32>} : memref<8x128xf32, #tpu.memory_space<vmem>>, vector<8x128xf32>,
    } else {
    }
    return
  }
  func.func @transform_0(%arg0: i32, %arg1: i32) -> (i32, i32) {
    %c1_i32 = arith.constant 1 : i32
    %0 = arith.muli %arg0, %c1_i32 : i32
    %1 = arith.addi %0, %arg1 : i32
    %c0_i32 = arith.constant 0 : i32
    %2 = arith.minsi %1, %c0_i32 : i32
    %c0_i32_0 = arith.constant 0 : i32
    %c0_i32_1 = arith.constant 0 : i32
    return %2, %c0_i32_0 : i32, i32
  }
  func.func @transform_1(%arg0: i32, %arg1: i32) -> (i32, i32) {
    %c1_i32 = arith.constant 1 : i32
    %0 = arith.muli %arg0, %c1_i32 : i32
    %1 = arith.addi %0, %arg1 : i32
    %c0_i32 = arith.constant 0 : i32
    %2 = arith.minsi %1, %c0_i32 : i32
    %c0_i32_0 = arith.constant 0 : i32
    %c0_i32_1 = arith.constant 0 : i32
    return %2, %c0_i32_0 : i32, i32
  }
  func.func @transform_2(%arg0: i32, %arg1: i32) -> (i32, i32) {
    %c0_i32 = arith.constant 0 : i32
    %c0_i32_0 = arith.constant 0 : i32
    return %arg0, %c0_i32 : i32, i32
  }
}

</mosaic_0001>

<bundles_post_ra>
// kernel: coca_loss.2
= control target key start
LH: loop header
LB: loop body
LE: loop exit
PB: predicated region body
PF: predicated region fallthrough
CT: control target
= control target key end

     0   :  { %9 = vsyncpa [#allocation4], 0  ;;  %s439_s0 = inlined_call_operand.hbm [shape: f32[8,32], index: 0, kind: input, shape index: {}]   ;;  %s440_s1 = inlined_call_operand.hbm [shape: f32[8,32], index: 1, kind: input, shape index: {}]   ;;  %s441_s2 = inlined_call_operand.<no memory space> [shape: f32[1], index: 2, kind: input, shape index: {}]   ;;  %s442_s3 = inlined_call_operand.hbm [shape: f32[1], index: 3, kind: output, shape index: {}]  }
   0x1   :  { %10 = vsyncpa [#allocation7], 0 }
   0x2   :  { %11 = vsyncpa [#allocation5], 0  ;;  %s366_s12 = smov [#allocation3]   ;;  %s367_s14 = smov [#allocation6]  }
   0x3   :  { %s18_s13 = sshll.u32 %s366_s12, 4  ;;  %s28_s15 = sshll.u32 %s367_s14, 4  ;;  %s19_s13 = int_to_ptr.vmem [resolvable:$true] %s18_s13  ;;  %s29_s15 = int_to_ptr.vmem [resolvable:$true] %s28_s15 }
   0x4   :  { %s306_s18 = scalar_lea.hbm %s439_s0, 128 }
   0x5   :  { %p307_p0 = scmp.ne.s32.totalorder %s439_s0, %s306_s18  ;;  %p310_p1 = scmp.lt.u32.totalorder %s306_s18, %s439_s0 }
   0x7   :  { %p312_p2 = pnand %p310_p1, %p307_p0 }
   0x9   :  { %315 = shalt.err (!%p312_p2)
}
   0xa   :  { %s316_s23 = scalar_lea.vmem %s19_s13, 128  ;;  %p321_p4 = scmp.lt.s32.totalorder %s19_s13, %s19_s13 }
   0xb   :  { %p317_p3 = scmp.ne.s32.totalorder %s19_s13, %s316_s23  ;;  %p322_p5 = scmp.lt.s32.totalorder %s316_s23, %s316_s23 }
   0xd   :  { %p323_p6 = por %p322_p5, %p321_p4 }
   0xf   :  { %p324_p7 = pnand %p323_p6, %p317_p3 }
  0x11   :  { %327 = shalt.err (!%p324_p7)
}
  0x12   :  { %21 = dma.hbm_to_vmem [thread:$0]  %s439_s0, 128, %s19_s13, [#allocation4]  }
  0x13   :  { %s328_s28 = scalar_lea.hbm %s440_s1, 128 }
  0x14   :  { %p329_p8 = scmp.ne.s32.totalorder %s440_s1, %s328_s28  ;;  %p332_p9 = scmp.lt.u32.totalorder %s328_s28, %s440_s1 }
  0x16   :  { %p334_p10 = pnand %p332_p9, %p329_p8 }
  0x18   :  { %337 = shalt.err (!%p334_p10)
}
  0x19   :  { %s338_s6 = scalar_lea.vmem %s29_s15, 128  ;;  %p343_p12 = scmp.lt.s32.totalorder %s29_s15, %s29_s15 }
  0x1a   :  { %p339_p11 = scmp.ne.s32.totalorder %s29_s15, %s338_s6  ;;  %p344_p13 = scmp.lt.s32.totalorder %s338_s6, %s338_s6 }
  0x1c   :  { %p345_p0 = por %p344_p13, %p343_p12 }
  0x1e   :  { %p346_p1 = pnand %p345_p0, %p339_p11 }
  0x20   :  { %349 = shalt.err (!%p346_p1)
}
  0x21   :  { %31 = dma.hbm_to_vmem [thread:$0]  %s440_s1, 128, %s29_s15, [#allocation7]  }
  0x22   :  { %360 = dma.done.wait [#allocation4], 128  }
  0x23   :  { %361 = vsyncadd [#allocation4], 4294967168 }
  0x24   :  { %362 = dma.done.wait [#allocation7], 128  }
  0x25   :  { %363 = vsyncadd [#allocation7], 4294967168  ;;  %v368_v0 = vmov 0.0   ;;  %vm369_vm0 = vmmov 0   ;;  %vm44_vm1 = vcmask 261120   ;;  %v42_v1 = vld [vmem:[#allocation6] sm:$0xff]  ;;  %v48_v3 = vstv %s441_s2 }
  0x26   :  { %279 = vmatprep.subr.mxu0 %v368_v0  ;;  %281 = vmatprep.mubr.msk.f32.mxu0 %vm369_vm0, %v368_v0  ;;  %v41_v2 = vld [vmem:[#allocation3] sm:$0xff]  ;;  %vm127_vm2 = vcmask 64512   ;;  %vm224_vm3 = vcmask 7168   ;;  %s350_s16 = scalar_lea.hbm %s442_s3, 16 }
  0x27   :  { %284 = vmatprep.subr.mxu1 %v368_v0  ;;  %286 = vmatprep.mubr.msk.f32.mxu1 %vm369_vm0, %v368_v0  ;;  %v43_v12 = vmul.f32 %v42_v1, %v41_v2  ;;  %p351_p2 = scmp.ne.s32.totalorder %s442_s3, %s350_s16  ;;  %p354_p3 = scmp.lt.u32.totalorder %s350_s16, %s442_s3 }
  0x28   :  { %280 = vmatpush3.xpose.msk.msra.mxu0 %vm44_vm1, %v42_v1  ;;  %285 = vmatpush3.xpose.msk.msra.mxu1 %vm44_vm1, %v41_v2 }
  0x29   :  { %v45_v13 = vsel %vm44_vm1, %v43_v12, 0.0  ;;  %p356_p4 = pnand %p354_p3, %p351_p2 }
  0x2b   :  { %282 = vmatmul.mubr.msk.f32.vlgmr.msra.gmra.mrb[0].mxu0 %vm44_vm1, %v41_v2  ;;  %287 = vmatmul.mubr.msk.f32.vlgmr.msra.gmra.mrb[0].mxu1 %vm44_vm1, %v42_v1 }
  0xfe   :  { %v122_v4 = vpop.f32.mrb[0].mxu0  ;;  %v206_v5 = vpop.f32.mrb[0].mxu1 }
  0xff   :  { %v126_v6 = vmul.f32 %v122_v4, %v48_v3  ;;  %v283_v7 = vpop.f32.mrb[1].mxu0  ;;  %v210_v8 = vmul.f32 %v206_v5, %v48_v3  ;;  %v288_v9 = vpop.f32.mrb[1].mxu1 }
 0x101   :  { %v128_v10 = vsel %vm127_vm2, %v126_v6, -inf  ;;  %v211_v11 = vsel %vm127_vm2, %v210_v8, -inf }
 0x102   :  { %129 = vmax.xlane.f32.xlu0 %v128_v10 }
 0x106   :  { %212 = vmax.xlane.f32.xlu0 %v211_v11 }
 0x10a   :  { %46 = vadd.xlane.f32.xlu0 %v45_v13 }
 0x18f   :  { %v130_v14 = vpop.xlane.xlu0 %129 }
 0x190   :  { %v131_v15 = vsub.f32 %v126_v6, %v130_v14 }
 0x192   :  { %v132_v16 = vmul.f32 1.442695, %v131_v15 }
 0x193   :  { %v213_v17 = vpop.xlane.xlu0 %212 }
 0x194   :  { %298 = vpow2.f32 %v132_v16  ;;  %v214_v18 = vsub.f32 %v210_v8, %v213_v17 }
 0x196   :  { %v215_v19 = vmul.f32 1.442695, %v214_v18 }
 0x197   :  { %v47_v26 = vpop.xlane.xlu0 %46 }
 0x198   :  { %300 = vpow2.f32 %v215_v19  ;;  %v49_v29 = vmul.f32 %v48_v3, %v47_v26 }
 0x19e   :  { %v299_v20 = vpop.eup %298 }
 0x19f   :  { %v134_v21 = vsel %vm127_vm2, %v299_v20, 0.0 }
 0x1a0   :  { %135 = vadd.xlane.f32.xlu1 %v134_v21 }
 0x1a2   :  { %v301_v22 = vpop.eup %300 }
 0x1a3   :  { %v217_v23 = vsel %vm127_vm2, %v301_v22, 0.0 }
 0x1a4   :  { %218 = vadd.xlane.f32.xlu1 %v217_v23 }
 0x22d   :  { %v136_v24 = vpop.xlane.xlu1 %135 }
 0x22e   :  { %302 = vlog2.f32 %v136_v24 }
 0x231   :  { %v219_v25 = vpop.xlane.xlu1 %218 }
 0x232   :  { %304 = vlog2.f32 %v219_v25 }
 0x238   :  { %v303_v27 = vpop.eup %302 }
 0x239   :  { %v138_v28 = vmul.f32 0.6931472, %v303_v27 }
 0x23b   :  { %v139_v30 = vadd.f32 %v138_v28, %v130_v14 }
 0x23c   :  { %v305_v31 = vpop.eup %304 }
 0x23d   :  { %v221_v32 = vmul.f32 0.6931472, %v305_v31  ;;  %v223_v33 = vsub.f32 %v139_v30, %v49_v29 }
 0x23f   :  { %v225_v34 = vsel %vm224_vm3, %v223_v33, 0.0  ;;  %v222_v35 = vadd.f32 %v221_v32, %v213_v17 }
 0x240   :  { %226 = vadd.xlane.f32.xlu1 %v225_v34 }
 0x241   :  { %v238_v36 = vsub.f32 %v222_v35, %v49_v29 }
 0x243   :  { %v239_v37 = vsel %vm224_vm3, %v238_v36, 0.0 }
 0x244   :  { %240 = vadd.xlane.f32.xlu0 %v239_v37 }
 0x2cd   :  { %v227_v38 = vpop.xlane.xlu1 %226 }
 0x2ce   :  { %v228_v39 = vrot.slane %v227_v38, 4 }
 0x2d0   :  { %v229_v40 = vadd.f32 %v228_v39, %v227_v38 }
 0x2d1   :  { %v241_v41 = vpop.xlane.xlu0 %240 }
 0x2d2   :  { %v230_v42 = vrot.slane %v229_v40, 2  ;;  %v242_v43 = vrot.slane %v241_v41, 4 }
 0x2d4   :  { %v243_v44 = vadd.f32 %v242_v43, %v241_v41  ;;  %v231_v45 = vadd.f32 %v230_v42, %v229_v40 }
 0x2d6   :  { %v244_v46 = vrot.slane %v243_v44, 2  ;;  %v232_v47 = vrot.slane %v231_v45, 1 }
 0x2d8   :  { %v245_v48 = vadd.f32 %v244_v46, %v243_v44  ;;  %v233_v49 = vadd.f32 %v232_v47, %v231_v45 }
 0x2da   :  { %289 = vpush %v233_v49  ;;  %v246_v50 = vrot.slane %v245_v48, 1 }
 0x2dc   :  { %v247_v51 = vadd.f32 %v246_v50, %v245_v48 }
 0x2de   :  { %291 = vpush %v247_v51 }
 0x30b   :  { %s290_s2 = spop %289 }
 0x30c   :  { %s237_s9 = smul.f32 0.125, %s290_s2 }
 0x30f   :  { %s292_s10 = spop %291 }
 0x310   :  { %s251_s11 = smul.f32 0.125, %s292_s10 }
 0x312   :  { %s252_s12 = sadd.f32 %s251_s11, %s237_s9 }
 0x314   :  { %s253_s13 = smul.f32 0.5, %s252_s12 }
 0x316   :  { %255 = sst [smem:[#allocation8]] %s253_s13 }
 0x317   :  { %359 = shalt.err (!%p356_p4)
}
 0x318   :  { %s370_s21 = smov [#allocation8]  }
 0x319   :  { %263 = dma.smem_to_hbm %s370_s21, 16, %s442_s3, [#allocation5]  }
 0x31a   :  { %364 = dma.done.wait [#allocation5], 16  }
 0x31b   :  { %365 = vsyncadd [#allocation5], 4294967280 }
 0x31c   :  { %267 = sfence }
 0x31d   :  { %268 = vsyncpa [#allocation4], 1 }
 0x31e   :  { %269 = vsyncpa [#allocation7], 1 }
 0x31f   :  { %270 = vsyncpa [#allocation5], 1 }

// kernel: coca_loss.3
= control target key start
LH: loop header
LB: loop body
LE: loop exit
PB: predicated region body
PF: predicated region fallthrough
CT: control target
= control target key end

     0   :  { %7 = vsyncpa [#allocation5], 0  ;;  %s791_s0 = inlined_call_operand.hbm [shape: f32[64,128], index: 0, kind: input, shape index: {}]   ;;  %s792_s1 = inlined_call_operand.hbm [shape: s32[64,1], index: 1, kind: input, shape index: {}]   ;;  %s793_s2 = inlined_call_operand.hbm [shape: f32[8,128], index: 2, kind: output, shape index: {}]  }
   0x1   :  { %8 = vsyncpa [#allocation8], 0 }
   0x2   :  { %9 = vsyncpa [#allocation6], 0  ;;  %s571_s9 = smov [#allocation4]   ;;  %s499_s13 = scalar_lea.hbm %s791_s0, 1024 }
   0x3   :  { %s21_s10 = sshll.u32 %s571_s9, 4  ;;  %p500_p0 = scmp.ne.s32.totalorder %s791_s0, %s499_s13  ;;  %s22_s10 = int_to_ptr.vmem [resolvable:$true] %s21_s10 }
   0x4   :  { %p503_p1 = scmp.lt.u32.totalorder %s499_s13, %s791_s0 }
   0x6   :  { %p505_p2 = pnand %p503_p1, %p500_p0 }
   0x8   :  { %508 = shalt.err (!%p505_p2)
}
   0x9   :  { %s509_s18 = scalar_lea.vmem %s22_s10, 1024  ;;  %p514_p4 = scmp.lt.s32.totalorder %s22_s10, %s22_s10 }
   0xa   :  { %p510_p3 = scmp.ne.s32.totalorder %s22_s10, %s509_s18  ;;  %p515_p5 = scmp.lt.s32.totalorder %s509_s18, %s509_s18 }
   0xc   :  { %p516_p6 = por %p515_p5, %p514_p4 }
   0xe   :  { %p517_p7 = pnand %p516_p6, %p510_p3 }
  0x10   :  { %520 = shalt.err (!%p517_p7)
}
  0x11   :  { %s572_s19 = smov 128   ;;  %s573_s20 = smov 8  }
  0x12   :  { %27 = dma.hbm_to_vmem [thread:$0]  %s791_s0, 1024, %s22_s10, [#allocation5], %s572_s19, %s572_s19, %s573_s20  }
  0x13   :  { %s574_s23 = smov [#allocation7]   ;;  %s521_s27 = scalar_lea.hbm %s792_s1, 1024 }
  0x14   :  { %s39_s24 = sshll.u32 %s574_s23, 4  ;;  %p522_p8 = scmp.ne.s32.totalorder %s792_s1, %s521_s27  ;;  %s40_s24 = int_to_ptr.vmem [resolvable:$true] %s39_s24 }
  0x15   :  { %p525_p9 = scmp.lt.u32.totalorder %s521_s27, %s792_s1 }
  0x17   :  { %p527_p10 = pnand %p525_p9, %p522_p8 }
  0x19   :  { %530 = shalt.err (!%p527_p10)
}
  0x1a   :  { %s531_s4 = scalar_lea.vmem %s40_s24, 1024  ;;  %p536_p12 = scmp.lt.s32.totalorder %s40_s24, %s40_s24 }
  0x1b   :  { %p532_p11 = scmp.ne.s32.totalorder %s40_s24, %s531_s4  ;;  %p537_p13 = scmp.lt.s32.totalorder %s531_s4, %s531_s4 }
  0x1d   :  { %p538_p0 = por %p537_p13, %p536_p12 }
  0x1f   :  { %p539_p1 = pnand %p538_p0, %p532_p11 }
  0x21   :  { %542 = shalt.err (!%p539_p1)
}
  0x22   :  { %45 = dma.hbm_to_vmem [thread:$0]  %s792_s1, 1024, %s40_s24, [#allocation8], %s572_s19, %s572_s19, %s573_s20  }
  0x23   :  { %565 = dma.done.wait [#allocation5], 1024  }
  0x24   :  { %566 = vsyncadd [#allocation5], 4294966272 }
  0x25   :  { %567 = dma.done.wait [#allocation8], 1024  }
  0x26   :  { %568 = vsyncadd [#allocation8], 4294966272  ;;  %vm64_vm0 = vcmask 7168   ;;  %v575_v0 = vmov 0   ;;  %v576_v1 = vmov 0.0   ;;  %v649_v2 = vld [vmem:[#allocation4 + $0x10] sm:$0xff] }
  0x27   :  { %466 = vset.pattern.permute.xlu1 %v575_v0  ;;  %74 = vst.msk [vmem:[#allocation3 + $0x8] sm:$0xff] %vm64_vm0, %v576_v1  ;;  %65 = vst.msk [vmem:[#allocation2] sm:$0xff] %vm64_vm0, %v576_v1  ;;  %465 = vset.pattern.permute.xlu0 %v575_v0  ;;  %v651_v3 = vld [vmem:[#allocation4] sm:$0xff]  ;;  %v655_v4 = vld [vmem:[#allocation4 + $0x18] sm:$0xff]  ;;  %s577_s6 = smov [#allocation9]  }
  0x28   :  { %66 = vst.msk [vmem:[#allocation2 + $0x8] sm:$0xff] %vm64_vm0, %v576_v1  ;;  %67 = vst.msk [vmem:[#allocation2 + $0x10] sm:$0xff] %vm64_vm0, %v576_v1  ;;  %101 = vmax.xlane.f32.xlu1 %v649_v2  ;;  %97 = vmax.xlane.f32.xlu0 %v651_v3  ;;  %v657_v5 = vld [vmem:[#allocation4 + $0x8] sm:$0xff]  ;;  %v662_v8 = vld [vmem:[#allocation7 + $0x10] sm:$0xff]  ;;  %s432_s7 = sshll.u32 %s577_s6, 4  ;;  %s433_s7 = int_to_ptr.vmem [resolvable:$true] %s432_s7 }
  0x29   :  { %68 = vst.msk [vmem:[#allocation2 + $0x18] sm:$0xff] %vm64_vm0, %v576_v1  ;;  %69 = vst.msk [vmem:[#allocation2 + $0x20] sm:$0xff] %vm64_vm0, %v576_v1  ;;  %v659_v6 = vld [vmem:[#allocation7 + $0x8] sm:$0xff]  ;;  %v666_v11 = vld [vmem:[#allocation4 + $0x20] sm:$0xff]  ;;  %vm257_vm2 = vcmp.ne.s32.totalorder %v662_v8, 0  ;;  %s543_s9 = scalar_lea.vmem %s433_s7, 128  ;;  %p548_p3 = scmp.lt.s32.totalorder %s433_s7, %s433_s7 }
  0x2a   :  { %70 = vst.msk [vmem:[#allocation2 + $0x28] sm:$0xff] %vm64_vm0, %v576_v1  ;;  %71 = vst.msk [vmem:[#allocation2 + $0x30] sm:$0xff] %vm64_vm0, %v576_v1  ;;  %vm256_vm1 = vcmp.ne.s32.totalorder %v659_v6, 0  ;;  %v664_v10 = vld [vmem:[#allocation4 + $0x28] sm:$0xff]  ;;  %v672_v13 = vld [vmem:[#allocation7] sm:$0xff]  ;;  %v448_v17 = vsel %vm257_vm2, 1.0, %v576_v1  ;;  %p544_p2 = scmp.ne.s32.totalorder %s433_s7, %s543_s9  ;;  %p549_p4 = scmp.lt.s32.totalorder %s543_s9, %s543_s9 }
  0x2b   :  { %72 = vst.msk [vmem:[#allocation2 + $0x38] sm:$0xff] %vm64_vm0, %v576_v1  ;;  %73 = vst.msk [vmem:[#allocation3] sm:$0xff] %vm64_vm0, %v576_v1  ;;  %v447_v12 = vsel %vm256_vm1, 1.0, %v576_v1  ;;  %v674_v15 = vld [vmem:[#allocation7 + $0x18] sm:$0xff]  ;;  %vm255_vm3 = vcmp.ne.s32.totalorder %v672_v13, 0  ;;  %v683_v19 = vld [vmem:[#allocation7 + $0x20] sm:$0xff] }
  0x2c   :  { %75 = vst.msk [vmem:[#allocation3 + $0x10] sm:$0xff] %vm64_vm0, %v576_v1  ;;  %76 = vst.msk [vmem:[#allocation3 + $0x18] sm:$0xff] %vm64_vm0, %v576_v1  ;;  %103 = vmax.xlane.f32.xlu1 %v655_v4  ;;  %99 = vmax.xlane.f32.xlu0 %v657_v5  ;;  %vm258_vm4 = vcmp.ne.s32.totalorder %v674_v15, 0  ;;  %v446_v22 = vsel %vm255_vm3, 1.0, %v576_v1  ;;  %vm259_vm5 = vcmp.ne.s32.totalorder %v683_v19, 0  ;;  %v692_v24 = vld [vmem:[#allocation7 + $0x28] sm:$0xff]  ;;  %p550_p5 = por %p549_p4, %p548_p3 }
  0x2d   :  { %77 = vst.msk [vmem:[#allocation3 + $0x20] sm:$0xff] %vm64_vm0, %v576_v1  ;;  %78 = vst.msk [vmem:[#allocation3 + $0x28] sm:$0xff] %vm64_vm0, %v576_v1  ;;  %v449_v23 = vsel %vm258_vm4, 1.0, %v576_v1  ;;  %v694_v26 = vld [vmem:[#allocation7 + $0x30] sm:$0xff]  ;;  %v450_v29 = vsel %vm259_vm5, 1.0, %v576_v1  ;;  %vm260_vm6 = vcmp.ne.s32.totalorder %v692_v24, 0 }
  0x2e   :  { %79 = vst.msk [vmem:[#allocation3 + $0x30] sm:$0xff] %vm64_vm0, %v576_v1  ;;  %80 = vst.msk [vmem:[#allocation3 + $0x38] sm:$0xff] %vm64_vm0, %v576_v1  ;;  %v313_v7 = vld [vmem:[#allocation3 + $0x8] sm:$0xff]  ;;  %v701_v31 = vld [vmem:[#allocation7 + $0x38] sm:$0xff]  ;;  %v451_v34 = vsel %vm260_vm6, 1.0, %v576_v1  ;;  %vm261_vm7 = vcmp.ne.s32.totalorder %v694_v26, 0  ;;  %p551_p6 = pnand %p550_p5, %p544_p2 }
  0x2f   :  { %v337_v16 = vadd.f32 %v447_v12, %v313_v7  ;;  %vm262_vm8 = vcmp.ne.s32.totalorder %v701_v31, 0  ;;  %v452_v36 = vsel %vm261_vm7, 1.0, %v576_v1  ;;  %v88_v38 = vld [vmem:[#allocation4 + $0x38] sm:$0xff]  ;;  %v87_v39 = vld [vmem:[#allocation4 + $0x30] sm:$0xff] }
  0x30   :  { %107 = vmax.xlane.f32.xlu1 %v664_v10  ;;  %105 = vmax.xlane.f32.xlu0 %v666_v11  ;;  %v453_v37 = vsel %vm262_vm8, 1.0, %v576_v1 }
  0x31   :  { %345 = vst.msk [vmem:[#allocation3 + $0x8] sm:$0xff] %vm64_vm0, %v337_v16 }
  0x32   :  { %v312_v14 = vld [vmem:[#allocation3] sm:$0xff] }
  0x33   :  { %v314_v9 = vld [vmem:[#allocation3 + $0x10] sm:$0xff]  ;;  %v315_v18 = vld [vmem:[#allocation3 + $0x18] sm:$0xff]  ;;  %v336_v27 = vadd.f32 %v446_v22, %v312_v14 }
  0x34   :  { %v316_v20 = vld [vmem:[#allocation3 + $0x20] sm:$0xff]  ;;  %v338_v21 = vadd.f32 %v448_v17, %v314_v9  ;;  %v317_v25 = vld [vmem:[#allocation3 + $0x28] sm:$0xff]  ;;  %v339_v28 = vadd.f32 %v449_v23, %v315_v18  ;;  %111 = vmax.xlane.f32.xlu1 %v88_v38  ;;  %109 = vmax.xlane.f32.xlu0 %v87_v39  ;;  %v153_v9 = vlaneseq }
  0x35   :  { %v318_v30 = vld [vmem:[#allocation3 + $0x30] sm:$0xff]  ;;  %v319_v32 = vld [vmem:[#allocation3 + $0x38] sm:$0xff]  ;;  %v340_v33 = vadd.f32 %v450_v29, %v316_v20  ;;  %344 = vst.msk [vmem:[#allocation3] sm:$0xff] %vm64_vm0, %v336_v27  ;;  %v341_v35 = vadd.f32 %v451_v34, %v317_v25 }
  0x36   :  { %346 = vst.msk [vmem:[#allocation3 + $0x10] sm:$0xff] %vm64_vm0, %v338_v21  ;;  %347 = vst.msk [vmem:[#allocation3 + $0x18] sm:$0xff] %vm64_vm0, %v339_v28  ;;  %v342_v40 = vadd.f32 %v452_v36, %v318_v30  ;;  %v343_v41 = vadd.f32 %v453_v37, %v319_v32  ;;  %v154_v14 = vand.u32 127, %v153_v9 }
  0x37   :  { %348 = vst.msk [vmem:[#allocation3 + $0x20] sm:$0xff] %vm64_vm0, %v340_v33  ;;  %349 = vst.msk [vmem:[#allocation3 + $0x28] sm:$0xff] %vm64_vm0, %v341_v35 }
  0x38   :  { %350 = vst.msk [vmem:[#allocation3 + $0x30] sm:$0xff] %vm64_vm0, %v342_v40  ;;  %351 = vst.msk [vmem:[#allocation3 + $0x38] sm:$0xff] %vm64_vm0, %v343_v41  ;;  %v388_v37 = vld [vmem:[#allocation3 + $0x8] sm:$0xff] }
  0x3c   :  { %v387_v36 = vld [vmem:[#allocation3] sm:$0xff] }
  0x3d   :  { %v389_v40 = vld [vmem:[#allocation3 + $0x10] sm:$0xff] }
  0x45   :  { %159 = vperm.xlu1 %466, %v659_v6  }
  0x49   :  { %162 = vperm.xlu1 %466, %v662_v8  }
  0x4a   :  { %156 = vperm.xlu0 %465, %v672_v13  }
  0x4d   :  { %165 = vperm.xlu1 %466, %v674_v15  }
  0x51   :  { %168 = vperm.xlu1 %466, %v683_v19  }
  0x55   :  { %171 = vperm.xlu1 %466, %v692_v24  }
  0x59   :  { %174 = vperm.xlu1 %466, %v694_v26  }
  0x5d   :  { %177 = vperm.xlu1 %466, %v701_v31  }
  0xb5   :  { %v102_v42 = vpop.xlane.xlu1 %101  ;;  %v98_v43 = vpop.xlane.xlu0 %97 }
  0xb6   :  { %v113_v44 = vsub.f32 %v651_v3, %v98_v43  ;;  %v115_v50 = vsub.f32 %v649_v2, %v102_v42  ;;  %v398_v42 = vsel %vm64_vm0, %v389_v40, 0.0  ;;  %v390_v43 = vld [vmem:[#allocation3 + $0x18] sm:$0xff] }
  0xb8   :  { %v121_v45 = vmul.f32 1.442695, %v113_v44  ;;  %v125_v57 = vmul.f32 1.442695, %v115_v50 }
  0xb9   :  { %v104_v46 = vpop.xlane.xlu1 %103  ;;  %v100_v47 = vpop.xlane.xlu0 %99 }
  0xba   :  { %v116_v48 = vsub.f32 %v655_v4, %v104_v46  ;;  %v114_v49 = vsub.f32 %v657_v5, %v100_v47  ;;  %467 = vpow2.f32 %v121_v45  ;;  %v400_v45 = vsel %vm64_vm0, %v390_v43, 0.0  ;;  %v391_v46 = vld [vmem:[#allocation3 + $0x20] sm:$0xff]  ;;  %v281_v43 = vld [vmem:[#allocation2 + $0x10] sm:$0xff] }
  0xbc   :  { %v127_v51 = vmul.f32 1.442695, %v116_v48  ;;  %v123_v52 = vmul.f32 1.442695, %v114_v49 }
  0xbd   :  { %v108_v53 = vpop.xlane.xlu1 %107  ;;  %v106_v54 = vpop.xlane.xlu0 %105 }
  0xbe   :  { %469 = vpow2.f32 %v127_v51  ;;  %v118_v55 = vsub.f32 %v664_v10, %v108_v53  ;;  %v117_v56 = vsub.f32 %v666_v11, %v106_v54  ;;  %v394_v51 = vld [vmem:[#allocation3 + $0x38] sm:$0xff] }
  0xbf   :  { %471 = vpow2.f32 %v123_v52 }
  0xc0   :  { %v131_v58 = vmul.f32 1.442695, %v118_v55  ;;  %v129_v60 = vmul.f32 1.442695, %v117_v56 }
  0xc1   :  { %v112_v59 = vpop.xlane.xlu1 %111  ;;  %v110_v61 = vpop.xlane.xlu0 %109 }
  0xc2   :  { %473 = vpow2.f32 %v131_v58  ;;  %v120_v62 = vsub.f32 %v88_v38, %v112_v59  ;;  %v119_v63 = vsub.f32 %v87_v39, %v110_v61  ;;  %v395_v38 = vsel %vm64_vm0, %v387_v36, 0.0 }
  0xc3   :  { %475 = vpow2.f32 %v125_v57  ;;  %v396_v39 = vsel %vm64_vm0, %v388_v37, 0.0 }
  0xc4   :  { %v135_v0 = vmul.f32 1.442695, %v120_v62  ;;  %v468_v1 = vpop.eup %467  ;;  %477 = vpow2.f32 %v129_v60  ;;  %v133_v3 = vmul.f32 1.442695, %v119_v63  ;;  %v397_v41 = vadd.f32 %v396_v39, %v395_v38 }
  0xc5   :  { %v160_v2 = vpop.permute.xlu1 %159  ;;  %137 = vadd.xlane.f32.xlu1 %v468_v1 }
  0xc6   :  { %479 = vpow2.f32 %v135_v0  ;;  %vm180_vm9 = vcmp.eq.s32.totalorder %v154_v14, %v160_v2 }
  0xc7   :  { %481 = vpow2.f32 %v133_v3  ;;  %v188_v23 = vsel %vm180_vm9, %v114_v49, 0.0  ;;  %v392_v49 = vld [vmem:[#allocation3 + $0x28] sm:$0xff] }
  0xc8   :  { %v470_v4 = vpop.eup %469  ;;  %v404_v53 = vsel %vm64_vm0, %v392_v49, 0.0 }
  0xc9   :  { %v472_v5 = vpop.eup %471  ;;  %v163_v7 = vpop.permute.xlu1 %162  ;;  %143 = vadd.xlane.f32.xlu1 %v470_v4 }
  0xca   :  { %139 = vadd.xlane.f32.xlu0 %v472_v5  ;;  %v157_v21 = vpop.permute.xlu0 %156  ;;  %vm181_vm12 = vcmp.eq.s32.totalorder %v154_v14, %v163_v7 }
  0xcb   :  { %vm179_vm10 = vcmp.eq.s32.totalorder %v154_v14, %v157_v21  ;;  %v189_v32 = vsel %vm181_vm12, %v115_v50, 0.0  ;;  %v393_v50 = vld [vmem:[#allocation3 + $0x30] sm:$0xff] }
  0xcc   :  { %v474_v10 = vpop.eup %473  ;;  %v187_v28 = vsel %vm179_vm10, %v113_v44, 0.0  ;;  %v399_v44 = vadd.f32 %v398_v42, %v397_v41  ;;  %v406_v54 = vsel %vm64_vm0, %v393_v50, 0.0  ;;  %v284_v41 = vld [vmem:[#allocation2 + $0x28] sm:$0xff] }
  0xcd   :  { %v476_v11 = vpop.eup %475  ;;  %v166_v12 = vpop.permute.xlu1 %165  ;;  %147 = vadd.xlane.f32.xlu1 %v474_v10 }
  0xce   :  { %141 = vadd.xlane.f32.xlu0 %v476_v11  ;;  %v478_v16 = vpop.eup %477  ;;  %vm182_vm11 = vcmp.eq.s32.totalorder %v154_v14, %v166_v12  ;;  %v401_v47 = vadd.f32 %v400_v45, %v399_v44 }
  0xcf   :  { %v190_v27 = vsel %vm182_vm11, %v116_v48, 0.0  ;;  %v402_v48 = vsel %vm64_vm0, %v391_v46, 0.0 }
  0xd0   :  { %v480_v17 = vpop.eup %479  ;;  %v403_v52 = vadd.f32 %v402_v48, %v401_v47 }
  0xd1   :  { %v169_v18 = vpop.permute.xlu1 %168  ;;  %151 = vadd.xlane.f32.xlu1 %v480_v17  ;;  %v482_v20 = vpop.eup %481 }
  0xd2   :  { %145 = vadd.xlane.f32.xlu0 %v478_v16  ;;  %vm183_vm14 = vcmp.eq.s32.totalorder %v154_v14, %v169_v18  ;;  %v280_v16 = vld [vmem:[#allocation2 + $0x8] sm:$0xff] }
  0xd3   :  { %v191_v34 = vsel %vm183_vm14, %v117_v56, 0.0  ;;  %v408_v56 = vsel %vm64_vm0, %v394_v51, 0.0 }
  0xd5   :  { %v172_v22 = vpop.permute.xlu1 %171  ;;  %197 = vadd.xlane.f32.xlu1 %v188_v23 }
  0xd6   :  { %149 = vadd.xlane.f32.xlu0 %v482_v20  ;;  %vm184_vm13 = vcmp.eq.s32.totalorder %v154_v14, %v172_v22 }
  0xd7   :  { %v192_v30 = vsel %vm184_vm13, %v118_v55, 0.0  ;;  %v405_v55 = vadd.f32 %v404_v53, %v403_v52  ;;  %v286_v52 = vld [vmem:[#allocation2 + $0x38] sm:$0xff] }
  0xd9   :  { %v175_v25 = vpop.permute.xlu1 %174  ;;  %201 = vadd.xlane.f32.xlu1 %v190_v27  ;;  %v407_v57 = vadd.f32 %v406_v54, %v405_v55  ;;  %v283_v54 = vld [vmem:[#allocation2 + $0x20] sm:$0xff] }
  0xda   :  { %195 = vadd.xlane.f32.xlu0 %v187_v28  ;;  %vm185_vm9 = vcmp.eq.s32.totalorder %v154_v14, %v175_v25  ;;  %v282_v25 = vld [vmem:[#allocation2 + $0x18] sm:$0xff]  ;;  %v279_v28 = vld [vmem:[#allocation2] sm:$0xff] }
  0xdb   :  { %v193_v35 = vsel %vm185_vm9, %v119_v63, 0.0  ;;  %v409_v58 = vadd.f32 %v408_v56, %v407_v57 }
  0xdd   :  { %v178_v29 = vpop.permute.xlu1 %177  ;;  %205 = vadd.xlane.f32.xlu1 %v192_v30 }
  0xde   :  { %vm186_vm15 = vcmp.eq.s32.totalorder %v154_v14, %v178_v29  ;;  %199 = vadd.xlane.f32.xlu0 %v189_v32 }
  0xdf   :  { %v194_v33 = vsel %vm186_vm15, %v120_v62, 0.0 }
  0xe1   :  { %209 = vadd.xlane.f32.xlu1 %v194_v33 }
  0xe2   :  { %203 = vadd.xlane.f32.xlu0 %v191_v34 }
  0xe5   :  { %410 = vadd.xlane.f32.xlu1 %v409_v58 }
  0xe6   :  { %207 = vadd.xlane.f32.xlu0 %v193_v35 }
 0x152   :  { %v138_v59 = vpop.xlane.xlu1 %137 }
 0x153   :  { %483 = vlog2.f32 %v138_v59 }
 0x156   :  { %v144_v60 = vpop.xlane.xlu1 %143 }
 0x157   :  { %v140_v61 = vpop.xlane.xlu0 %139  ;;  %485 = vlog2.f32 %v144_v60  ;;  %v285_v60 = vld [vmem:[#allocation2 + $0x30] sm:$0xff] }
 0x158   :  { %487 = vlog2.f32 %v140_v61 }
 0x15a   :  { %v148_v62 = vpop.xlane.xlu1 %147 }
 0x15b   :  { %v142_v63 = vpop.xlane.xlu0 %141  ;;  %489 = vlog2.f32 %v148_v62 }
 0x15c   :  { %491 = vlog2.f32 %v142_v63 }
 0x15d   :  { %v484_v2 = vpop.eup %483 }
 0x15e   :  { %v152_v0 = vpop.xlane.xlu1 %151  ;;  %v212_v17 = vmul.f32 0.6931472, %v484_v2 }
 0x15f   :  { %v146_v1 = vpop.xlane.xlu0 %145  ;;  %493 = vlog2.f32 %v152_v0 }
 0x160   :  { %495 = vlog2.f32 %v146_v1 }
 0x161   :  { %v486_v3 = vpop.eup %485 }
 0x162   :  { %v488_v4 = vpop.eup %487  ;;  %v198_v5 = vpop.xlane.xlu1 %197  ;;  %v218_v11 = vmul.f32 0.6931472, %v486_v3 }
 0x163   :  { %v150_v7 = vpop.xlane.xlu0 %149  ;;  %v214_v10 = vmul.f32 0.6931472, %v488_v4 }
 0x164   :  { %497 = vlog2.f32 %v150_v7 }
 0x165   :  { %v490_v12 = vpop.eup %489  ;;  %v228_v14 = vsub.f32 %v214_v10, %v198_v5 }
 0x166   :  { %v492_v18 = vpop.eup %491  ;;  %v202_v20 = vpop.xlane.xlu1 %201  ;;  %v222_v29 = vmul.f32 0.6931472, %v490_v12 }
 0x167   :  { %v196_v21 = vpop.xlane.xlu0 %195  ;;  %v288_v22 = vsel %vm256_vm1, %v228_v14, 0.0  ;;  %v230_v23 = vsub.f32 %v218_v11, %v202_v20  ;;  %v216_v35 = vmul.f32 0.6931472, %v492_v18 }
 0x168   :  { %v227_v27 = vsub.f32 %v212_v17, %v196_v21  ;;  %v296_v30 = vadd.f32 %v288_v22, %v280_v16 }
 0x169   :  { %v494_v32 = vpop.eup %493  ;;  %v290_v33 = vsel %vm258_vm4, %v230_v23, 0.0 }
 0x16a   :  { %v287_v34 = vsel %vm255_vm3, %v227_v27, 0.0  ;;  %v496_v36 = vpop.eup %495  ;;  %305 = vst.msk [vmem:[#allocation2 + $0x8] sm:$0xff] %vm64_vm0, %v296_v30  ;;  %v298_v37 = vadd.f32 %v290_v33, %v282_v25  ;;  %v206_v38 = vpop.xlane.xlu1 %205  ;;  %v226_v44 = vmul.f32 0.6931472, %v494_v32 }
 0x16b   :  { %v295_v6 = vadd.f32 %v287_v34, %v279_v28  ;;  %v200_v39 = vpop.xlane.xlu0 %199  ;;  %v232_v40 = vsub.f32 %v222_v29, %v206_v38  ;;  %v220_v45 = vmul.f32 0.6931472, %v496_v36 }
 0x16c   :  { %v229_v42 = vsub.f32 %v216_v35, %v200_v39  ;;  %307 = vst.msk [vmem:[#allocation2 + $0x18] sm:$0xff] %vm64_vm0, %v298_v37 }
 0x16d   :  { %304 = vst.msk [vmem:[#allocation2] sm:$0xff] %vm64_vm0, %v295_v6  ;;  %v292_v13 = vsel %vm260_vm6, %v232_v40, 0.0 }
 0x16e   :  { %v289_v15 = vsel %vm257_vm2, %v229_v42, 0.0  ;;  %v498_v46 = vpop.eup %497  ;;  %v300_v47 = vadd.f32 %v292_v13, %v284_v41  ;;  %v210_v49 = vpop.xlane.xlu1 %209  ;;  %v238_v41 = vshrl.u32 %v153_v9, 7 }
 0x16f   :  { %v297_v48 = vadd.f32 %v289_v15, %v281_v43  ;;  %v204_v50 = vpop.xlane.xlu0 %203  ;;  %v234_v51 = vsub.f32 %v226_v44, %v210_v49  ;;  %v224_v55 = vmul.f32 0.6931472, %v498_v46 }
 0x170   :  { %v231_v53 = vsub.f32 %v220_v45, %v204_v50  ;;  %309 = vst.msk [vmem:[#allocation2 + $0x28] sm:$0xff] %vm64_vm0, %v300_v47  ;;  %vm419_vm1 = vcmp.eq.s32.totalorder %v238_v41, 0 }
 0x171   :  { %306 = vst.msk [vmem:[#allocation2 + $0x10] sm:$0xff] %vm64_vm0, %v297_v48  ;;  %v294_v24 = vsel %vm262_vm8, %v234_v51, 0.0  ;;  %v356_v62 = vld [vmem:[#allocation2 + $0x8] sm:$0xff] }
 0x172   :  { %v291_v8 = vsel %vm259_vm5, %v231_v53, 0.0  ;;  %v302_v56 = vadd.f32 %v294_v24, %v286_v52  ;;  %v364_v19 = vsel %vm64_vm0, %v356_v62, 0.0  ;;  %v411_v27 = vpop.xlane.xlu1 %410 }
 0x173   :  { %v299_v57 = vadd.f32 %v291_v8, %v283_v54  ;;  %v208_v58 = vpop.xlane.xlu0 %207  ;;  %v358_v2 = vld [vmem:[#allocation2 + $0x18] sm:$0xff]  ;;  %v412_v28 = vrot.slane %v411_v27, 4 }
 0x174   :  { %v233_v59 = vsub.f32 %v224_v55, %v208_v58  ;;  %v355_v61 = vld [vmem:[#allocation2] sm:$0xff]  ;;  %311 = vst.msk [vmem:[#allocation2 + $0x38] sm:$0xff] %vm64_vm0, %v302_v56  ;;  %v368_v7 = vsel %vm64_vm0, %v358_v2, 0.0 }
 0x175   :  { %308 = vst.msk [vmem:[#allocation2 + $0x20] sm:$0xff] %vm64_vm0, %v299_v57  ;;  %v363_v63 = vsel %vm64_vm0, %v355_v61, 0.0  ;;  %v413_v29 = vadd.f32 %v412_v28, %v411_v27 }
 0x176   :  { %v293_v31 = vsel %vm261_vm7, %v233_v59, 0.0  ;;  %v365_v3 = vadd.f32 %v364_v19, %v363_v63 }
 0x177   :  { %v301_v0 = vadd.f32 %v293_v31, %v285_v60  ;;  %v360_v11 = vld [vmem:[#allocation2 + $0x28] sm:$0xff]  ;;  %v414_v30 = vrot.slane %v413_v29, 2 }
 0x178   :  { %v357_v1 = vld [vmem:[#allocation2 + $0x10] sm:$0xff]  ;;  %v372_v16 = vsel %vm64_vm0, %v360_v11, 0.0 }
 0x179   :  { %310 = vst.msk [vmem:[#allocation2 + $0x30] sm:$0xff] %vm64_vm0, %v301_v0  ;;  %v366_v4 = vsel %vm64_vm0, %v357_v1, 0.0  ;;  %v415_v35 = vadd.f32 %v414_v30, %v413_v29 }
 0x17a   :  { %v367_v5 = vadd.f32 %v366_v4, %v365_v3 }
 0x17b   :  { %v362_v18 = vld [vmem:[#allocation2 + $0x38] sm:$0xff]  ;;  %v416_v6 = vrot.slane %v415_v35, 1 }
 0x17c   :  { %v359_v10 = vld [vmem:[#allocation2 + $0x20] sm:$0xff]  ;;  %v369_v12 = vadd.f32 %v368_v7, %v367_v5  ;;  %v376_v23 = vsel %vm64_vm0, %v362_v18, 0.0 }
 0x17d   :  { %v370_v14 = vsel %vm64_vm0, %v359_v10, 0.0  ;;  %v417_v40 = vadd.f32 %v416_v6, %v415_v35 }
 0x17e   :  { %v371_v26 = vadd.f32 %v370_v14, %v369_v12 }
 0x180   :  { %v361_v17 = vld [vmem:[#allocation2 + $0x30] sm:$0xff]  ;;  %v373_v20 = vadd.f32 %v372_v16, %v371_v26 }
 0x181   :  { %v374_v21 = vsel %vm64_vm0, %v361_v17, 0.0  ;;  %vm420_vm0 = vcmp.eq.s32.totalorder %v238_v41, 1 }
 0x182   :  { %v375_v22 = vadd.f32 %v374_v21, %v373_v20 }
 0x184   :  { %v377_v25 = vadd.f32 %v376_v23, %v375_v22 }
 0x186   :  { %378 = vadd.xlane.f32.xlu0 %v377_v25 }
 0x213   :  { %v379_v32 = vpop.xlane.xlu0 %378 }
 0x214   :  { %v380_v33 = vrot.slane %v379_v32, 4 }
 0x216   :  { %v381_v34 = vadd.f32 %v380_v33, %v379_v32 }
 0x218   :  { %v382_v36 = vrot.slane %v381_v34, 2 }
 0x21a   :  { %v383_v37 = vadd.f32 %v382_v36, %v381_v34 }
 0x21c   :  { %v384_v38 = vrot.slane %v383_v37, 1 }
 0x21e   :  { %v385_v39 = vadd.f32 %v384_v38, %v383_v37 }
 0x220   :  { %454 = vpush %v385_v39 }
 0x221   :  { %456 = vpush %v417_v40 }
 0x251   :  { %s455_s1 = spop %454 }
 0x252   :  { %v423_v42 = vstv %s455_s1  ;;  %s457_s8 = spop %456 }
 0x253   :  { %v421_v43 = vstv %s457_s8 }
 0x254   :  { %v422_v44 = vsel %vm420_vm0, %v421_v43, 0.0 }
 0x255   :  { %v424_v13 = vsel %vm419_vm1, %v423_v42, %v422_v44 }
 0x256   :  { %425 = vst [vmem:[#allocation9] sm:$0xff] %v424_v13 }
 0x257   :  { %554 = shalt.err (!%p551_p6)
}
 0x258   :  { %s555_s12 = scalar_lea.hbm %s793_s2, 128 }
 0x259   :  { %p556_p7 = scmp.ne.s32.totalorder %s793_s2, %s555_s12  ;;  %p559_p8 = scmp.lt.u32.totalorder %s555_s12, %s793_s2 }
 0x25b   :  { %p561_p9 = pnand %p559_p8, %p556_p7 }
 0x25d   :  { %564 = shalt.err (!%p561_p9)
}
 0x25e   :  { %435 = dma.vmem_to_hbm [thread:$0]  %s433_s7, 128, %s793_s2, [#allocation6]  }
 0x25f   :  { %569 = dma.done.wait [#allocation6], 128  }
 0x260   :  { %570 = vsyncadd [#allocation6], 4294967168 }
 0x261   :  { %439 = vsyncpa [#allocation5], 1 }
 0x262   :  { %440 = vsyncpa [#allocation8], 1 }
 0x263   :  { %441 = vsyncpa [#allocation6], 1 }

</bundles_post_ra>
